<compile_context>
chip_gen: v7x
topology: tpu7x:2x2x1
jax: 0.10.0
libtpu: 0.0.40
codegen_flags: <defaults>
</compile_context>

<pallas_src>
import functools
import math

import jax
import jax.numpy as jnp
from jax.experimental import pallas as pl
from jax.experimental.pallas import tpu as pltpu


# -----------------------------------------------------------------------------
# Pallas kernels — pure aggregation passes, grid = (row tiles, reduction tiles).
# -----------------------------------------------------------------------------
def gcn_agg1_kernel(a_ref, t1_ref, b1_ref, w2_ref, t2_ref, acc_ref):
    """Layer-1 aggregation with fused layer-2 feature transform.

    acc[i] = sum_k A_hat[i,k] @ T1[k]           (f32 accumulate)
    h1[i]  = relu(acc[i] + b1)                  (finalize, once per row tile)
    T2[i]  = h1[i] @ W2                         (stored bf16)
    """
    k = pl.program_id(1)

    @pl.when(k == 0)
    def _():
        acc_ref[...] = jnp.zeros_like(acc_ref)

    acc_ref[...] += jnp.dot(a_ref[...], t1_ref[...],
                            preferred_element_type=jnp.float32)

    @pl.when(k == pl.num_programs(1) - 1)
    def _():
        h1 = jnp.maximum(acc_ref[...] + b1_ref[...], 0.0)
        t2 = jnp.dot(h1.astype(jnp.bfloat16), w2_ref[...],
                     preferred_element_type=jnp.float32)
        t2_ref[...] = t2.astype(t2_ref.dtype)


def gcn_agg2_kernel(a_ref, t2_ref, b2_ref, out_ref, acc_ref):
    """out[i] = sum_k A_hat[i,k] @ T2[k] + b2."""
    k = pl.program_id(1)

    @pl.when(k == 0)
    def _():
        acc_ref[...] = jnp.zeros_like(acc_ref)

    acc_ref[...] += jnp.dot(a_ref[...], t2_ref[...],
                            preferred_element_type=jnp.float32)

    @pl.when(k == pl.num_programs(1) - 1)
    def _():
        out_ref[...] = (acc_ref[...] + b2_ref[...]).astype(out_ref.dtype)


# -----------------------------------------------------------------------------
# Helpers: padding, tile selection, normalized adjacency.
# -----------------------------------------------------------------------------
def _round_up(x, m):
    return (x + m - 1) // m * m


def _pick_tiles(n, tm, tk):
    """Clamp (tm, tk) to the padded node count; keep tm | tk and the zero-pad
    fraction of the streamed A_hat small for mid-sized N."""
    n_pad = _round_up(n, 128)
    tk = min(tk, n_pad)
    # Shrink tk (power-of-two defaults) if padding n up to tk would waste >12.5%.
    while tk > 256 and (_round_up(n_pad, tk) - n_pad) * 8 > n_pad:
        tk //= 2
    tm = min(tm, tk)
    if tk % tm:
        tm = math.gcd(tm, tk)   # both multiples of 128 -> gcd >= 128
    n_pad = _round_up(n_pad, tk)
    return n_pad, tm, tk


def build_norm_adj(edge_index, n, n_pad=None, dtype=jnp.float32):
    """Dense D^-1/2 (A + I) D^-1/2, aggregation at target (row=dst, col=src),
    built directly at padded size (padded rows/cols all-zero) and cast to
    `dtype` in the same fused expression (no separate pad / convert pass).
    NOTE: assumes a clean edge_index (no duplicates / pre-existing self-loops),
    matching PyG's coalesced input convention."""
    if n_pad is None:
        n_pad = n
    src, dst = edge_index[0], edge_index[1]
    loop = jnp.arange(n, dtype=src.dtype)
    src = jnp.concatenate([src, loop])
    dst = jnp.concatenate([dst, loop])
    a = jnp.zeros((n_pad, n_pad), jnp.float32).at[dst, src].add(1.0)
    deg = a.sum(axis=1)
    dinv = jnp.where(deg > 0, 1.0 / jnp.sqrt(deg), 0.0)
    return (a * dinv[:, None] * dinv[None, :]).astype(dtype)


# -----------------------------------------------------------------------------
# Wrapper: padded bf16 A_hat, hoisted T1, two tiled aggregation pallas_calls.
# -----------------------------------------------------------------------------
@functools.partial(jax.jit, static_argnames=("tm", "tk", "vmem_limit_bytes"))
def gcn_anchored_forward(x, anchors, edge_index, w1, b1, w2, b2, *,
                         tm=1024, tk=2048,
                         vmem_limit_bytes=48 * 1024 * 1024):
    n, c_in = x.shape
    hidden = w1.shape[1]
    out_c = w2.shape[1]
    f32, bf16 = jnp.float32, jnp.bfloat16

    # Lane-dense padded widths (unmasked vst for T2 / logits stores).
    h_pad = _round_up(hidden, 128)
    o_pad = _round_up(out_c, 128)
    n_pad, tm, tk = _pick_tiles(n, tm, tk)

    # Normalized adjacency, built directly at padded size in bf16.
    a_p = build_norm_adj(edge_index, n, n_pad, bf16)

    # Algebraic elimination of cat((x - anc, anc), dim=1):
    #   [x - anc, anc] @ [W1a; W1b] == x @ W1a + anc @ (W1b - W1a)
    # Hoisted out of the (i, k) grid: T1 depends only on the node (k) index.
    w1f = w1.astype(f32)
    w1a, w1b = w1f[:c_in], w1f[c_in:]
    t1 = x.astype(f32) @ w1a + anchors.astype(f32) @ (w1b - w1a)
    t1 = jnp.pad(t1, ((0, n_pad - n), (0, h_pad - hidden))).astype(bf16)

    b1_p = jnp.pad(jnp.reshape(b1, (1, -1)).astype(f32),
                   ((0, 0), (0, h_pad - hidden)))
    w2_p = jnp.pad(w2.astype(f32),
                   ((0, h_pad - hidden), (0, o_pad - out_c))).astype(bf16)
    b2_p = jnp.pad(jnp.reshape(b2, (1, -1)).astype(f32),
                   ((0, 0), (0, o_pad - out_c)))

    grid = (n_pad // tm, n_pad // tk)
    cparams = pltpu.CompilerParams(
        dimension_semantics=("parallel", "arbitrary"),
        vmem_limit_bytes=vmem_limit_bytes,
    )

    # ---- pass 1: T2 = relu(A_hat @ T1 + b1) @ W2  (h1 never hits HBM) -------
    t2 = pl.pallas_call(
        gcn_agg1_kernel,
        out_shape=jax.ShapeDtypeStruct((n_pad, o_pad), bf16),
        grid_spec=pltpu.PrefetchScalarGridSpec(
            num_scalar_prefetch=0,
            grid=grid,
            in_specs=[
                pl.BlockSpec((tm, tk), lambda i, k: (i, k)),        # A_hat tile
                pl.BlockSpec((tk, h_pad), lambda i, k: (k, 0)),     # T1 rows
                pl.BlockSpec((1, h_pad), lambda i, k: (0, 0)),      # b1
                pl.BlockSpec((h_pad, o_pad), lambda i, k: (0, 0)),  # W2
            ],
            out_specs=pl.BlockSpec((tm, o_pad), lambda i, k: (i, 0)),
            scratch_shapes=[pltpu.VMEM((tm, h_pad), f32)],
        ),
        compiler_params=cparams,
    )(a_p, t1, b1_p, w2_p)

    # ---- pass 2: out = A_hat @ T2 + b2 ---------------------------------------
    out_p = pl.pallas_call(
        gcn_agg2_kernel,
        out_shape=jax.ShapeDtypeStruct((n_pad, o_pad), f32),
        grid_spec=pltpu.PrefetchScalarGridSpec(
            num_scalar_prefetch=0,
            grid=grid,
            in_specs=[
                pl.BlockSpec((tm, tk), lambda i, k: (i, k)),     # A_hat tile
                pl.BlockSpec((tk, o_pad), lambda i, k: (k, 0)),  # T2 rows
                pl.BlockSpec((1, o_pad), lambda i, k: (0, 0)),   # b2
            ],
            out_specs=pl.BlockSpec((tm, o_pad), lambda i, k: (i, 0)),
            scratch_shapes=[pltpu.VMEM((tm, o_pad), f32)],
        ),
        compiler_params=cparams,
    )(a_p, t2, b2_p)

    return out_p[:n, :out_c]


# -----------------------------------------------------------------------------
# Plain-JAX glue: anchor sampling, reference model.
# -----------------------------------------------------------------------------
def sample_class_anchors(key, labels, class_means, class_stds):
    """Per-node anchor drawn from its class' Gaussian (class_anchoring_dist)."""
    n = labels.shape[0]
    feat = class_means.shape[1]
    noise = jax.random.normal(key, (n, feat), dtype=jnp.float32)
    return class_means[labels] + class_stds[labels] * noise


def gcn_anchored_ref(x, anchors, edge_index, w1, b1, w2, b2):
    """Pure-JAX f32 reference of the module forward (dropout=False)."""
    a_hat = build_norm_adj(edge_index, x.shape[0])
    h0 = jnp.concatenate([x - anchors, anchors], axis=-1)
    h1 = jnp.maximum(a_hat @ (h0 @ w1) + jnp.reshape(b1, (1, -1)), 0.0)
    return a_hat @ (h1 @ w2) + jnp.reshape(b2, (1, -1))


# -----------------------------------------------------------------------------
# Main
# -----------------------------------------------------------------------------
if __name__ == "__main__":
    def glorot(key, fan_in, fan_out):
        limit = jnp.sqrt(6.0 / (fan_in + fan_out))
        return jax.random.uniform(key, (fan_in, fan_out), jnp.float32,
                                  -limit, limit)

    def ring_edges(n, skips=(1,)):
        idx = jnp.arange(n)
        srcs, dsts = [], []
        for s in skips:
            srcs += [idx, (idx + s) % n]
            dsts += [(idx + s) % n, idx]
        return jnp.stack([jnp.concatenate(srcs),
                          jnp.concatenate(dsts)]).astype(jnp.int32)

    def run_case(n, c_in, hidden, out_c, num_classes, skips, tm, tk):
        root = jax.random.PRNGKey(0)
        (k_x, k_w1, k_w2, k_b1, k_b2,
         k_mu, k_sig, k_anc, k_lab) = jax.random.split(root, 9)

        x = jax.random.normal(k_x, (n, c_in), dtype=jnp.float32)
        labels = jax.random.randint(k_lab, (n,), 0, num_classes)
        class_means = jax.random.normal(k_mu, (num_classes, c_in), jnp.float32)
        class_stds = 0.1 + 0.05 * jax.random.uniform(
            k_sig, (num_classes, c_in), dtype=jnp.float32)
        anchors = sample_class_anchors(k_anc, labels, class_means, class_stds)
        edge_index = ring_edges(n, skips)

        w1 = glorot(k_w1, 2 * c_in, hidden)            # GCNConv(2*in, hidden)
        b1 = 0.1 * jax.random.normal(k_b1, (hidden,), jnp.float32)
        w2 = glorot(k_w2, hidden, out_c)               # GCNConv(hidden, out)
        b2 = 0.1 * jax.random.normal(k_b2, (out_c,), jnp.float32)

        out = gcn_anchored_forward(x, anchors, edge_index, w1, b1, w2, b2,
                                   tm=tm, tk=tk)
        jax.block_until_ready(out)
        assert out.shape == (n, out_c)

        # Correctness vs pure-JAX f32 reference (bf16 MXU path tolerance).
        ref = gcn_anchored_ref(x, anchors, edge_index, w1, b1, w2, b2)
        err = float(jnp.max(jnp.abs(out - ref)))
        scale = max(1.0, float(jnp.max(jnp.abs(ref))))
        assert err <= 5e-2 * scale, f"n={n}: max abs err {err} (scale {scale})"

    # Case 1: module-consistent small shapes, single (128, 128) tile.
    run_case(n=16, c_in=8, hidden=32, out_c=4, num_classes=3,
             skips=(1,), tm=1024, tk=2048)

    # Case 2: multi row-tile / multi reduction-tile grid (grid = (4, 2)),
    # exercising the pl.when init/finalize accumulator path and padding logic.
    run_case(n=512, c_in=8, hidden=32, out_c=4, num_classes=3,
             skips=(1, 7), tm=128, tk=256)

    print("KERNEL_OK")
</pallas_src>

<mosaic_0001>
module attributes {stable_mosaic.version = 11 : i64} {
  func.func private @main(%arg0: i32) attributes {dimension_semantics = [#tpu.dimension_semantics<core_parallel>], iteration_bounds = array<i64: 2>, tpu.core_type = #tpu.core_type<sc_scalar_subcore>, window_params = []} {
    return
  }
}

module attributes {stable_mosaic.version = 11 : i64} {
  func.func private @main(%arg0: i32) attributes {dimension_semantics = [#tpu.dimension_semantics<core_parallel>], iteration_bounds = array<i64: 2>, tpu.core_type = #tpu.core_type<sc_scalar_subcore>, window_params = []} {
    return
  }
}

module attributes {stable_mosaic.version = 11 : i64} {
  func.func @gcn_agg1_kernel(%arg0: i32, %arg1: i32, %arg2: memref<128x128xbf16, #tpu.memory_space<vmem>>, %arg3: memref<128x128xbf16, #tpu.memory_space<vmem>>, %arg4: memref<1x128xf32, #tpu.memory_space<vmem>>, %arg5: memref<128x128xbf16, #tpu.memory_space<vmem>>, %arg6: memref<128x128xbf16, #tpu.memory_space<vmem>>, %arg7: memref<128x128xf32, #tpu.memory_space<vmem>>) attributes {dimension_semantics = [#tpu.dimension_semantics<parallel>, #tpu.dimension_semantics<arbitrary>], iteration_bounds = array<i64: 1, 1>, scalar_prefetch = 0 : i64, scratch_operands = 1 : i64, tpu.core_type = #tpu.core_type<tc>, window_params = [{transform_indices = @transform_0, window_bounds = array<i64: 128, 128>}, {transform_indices = @transform_1, window_bounds = array<i64: 128, 128>}, {pipeline_mode = #tpu.pipeline_mode<synchronous>, transform_indices = @transform_2, window_bounds = array<i64: 1, 128>}, {pipeline_mode = #tpu.pipeline_mode<synchronous>, transform_indices = @transform_3, window_bounds = array<i64: 128, 128>}, {transform_indices = @transform_4, window_bounds = array<i64: 128, 128>}]} {
    %c0_i32 = arith.constant 0 : i32
    %0 = arith.cmpi eq, %arg1, %c0_i32 : i32
    %1 = arith.extui %0 : i1 to i32
    %c0_i32_0 = arith.constant 0 : i32
    %2 = arith.cmpi ne, %1, %c0_i32_0 : i32
    scf.if %2 {
      %cst_10 = arith.constant 0.000000e+00 : f32
      %12 = vector.broadcast %cst_10 : f32 to vector<128x128xf32>
      %c0_11 = arith.constant 0 : index
      %c0_12 = arith.constant 0 : index
      %13 = vector.load %arg7[%c0_11, %c0_12] : memref<128x128xf32, #tpu.memory_space<vmem>>, vector<128x128xf32>
      tpu.vector_store %arg7[%c0_11, %c0_12], %12 {strides = array<i32>} : memref<128x128xf32, #tpu.memory_space<vmem>>, vector<128x128xf32>,
    } else {
    }
    %c0 = arith.constant 0 : index
    %c0_1 = arith.constant 0 : index
    %3 = vector.load %arg7[%c0, %c0_1] : memref<128x128xf32, #tpu.memory_space<vmem>>, vector<128x128xf32>
    %c0_2 = arith.constant 0 : index
    %c0_3 = arith.constant 0 : index
    %4 = vector.load %arg2[%c0_2, %c0_3] : memref<128x128xbf16, #tpu.memory_space<vmem>>, vector<128x128xbf16>
    %c0_4 = arith.constant 0 : index
    %c0_5 = arith.constant 0 : index
    %5 = vector.load %arg3[%c0_4, %c0_5] : memref<128x128xbf16, #tpu.memory_space<vmem>>, vector<128x128xbf16>
    %cst = arith.constant dense<0.000000e+00> : vector<128x128xf32>
    %6 = tpu.matmul %4, %5, %cst {dimension_numbers = #tpu.dot_dimension_numbers<[1], [0], [0], [1], [0, 0, 1, 1], [], []>} : vector<128x128xbf16>, vector<128x128xbf16>, vector<128x128xf32> -> vector<128x128xf32>
    %7 = arith.addf %3, %6 : vector<128x128xf32>
    %c0_6 = arith.constant 0 : index
    %c0_7 = arith.constant 0 : index
    %8 = vector.load %arg7[%c0_6, %c0_7] : memref<128x128xf32, #tpu.memory_space<vmem>>, vector<128x128xf32>
    tpu.vector_store %arg7[%c0_6, %c0_7], %7 {strides = array<i32>} : memref<128x128xf32, #tpu.memory_space<vmem>>, vector<128x128xf32>,
    %c0_i32_8 = arith.constant 0 : i32
    %9 = arith.cmpi eq, %arg1, %c0_i32_8 : i32
    %10 = arith.extui %9 : i1 to i32
    %c0_i32_9 = arith.constant 0 : i32
    %11 = arith.cmpi ne, %10, %c0_i32_9 : i32
    scf.if %11 {
      %c0_10 = arith.constant 0 : index
      %c0_11 = arith.constant 0 : index
      %12 = vector.load %arg7[%c0_10, %c0_11] : memref<128x128xf32, #tpu.memory_space<vmem>>, vector<128x128xf32>
      %c0_12 = arith.constant 0 : index
      %c0_13 = arith.constant 0 : index
      %13 = vector.load %arg4[%c0_12, %c0_13] : memref<1x128xf32, #tpu.memory_space<vmem>>, vector<1x128xf32>
      %14 = vector.broadcast %13 : vector<1x128xf32> to vector<128x128xf32>
      %15 = arith.addf %12, %14 : vector<128x128xf32>
      %cst_14 = arith.constant 0.000000e+00 : f32
      %16 = vector.broadcast %cst_14 : f32 to vector<128x128xf32>
      %17 = arith.maximumf %15, %16 : vector<128x128xf32>
      %18 = arith.truncf %17 : vector<128x128xf32> to vector<128x128xbf16>
      %c0_15 = arith.constant 0 : index
      %c0_16 = arith.constant 0 : index
      %19 = vector.load %arg5[%c0_15, %c0_16] : memref<128x128xbf16, #tpu.memory_space<vmem>>, vector<128x128xbf16>
      %cst_17 = arith.constant dense<0.000000e+00> : vector<128x128xf32>
      %20 = tpu.matmul %18, %19, %cst_17 {dimension_numbers = #tpu.dot_dimension_numbers<[1], [0], [0], [1], [0, 0, 1, 1], [], []>} : vector<128x128xbf16>, vector<128x128xbf16>, vector<128x128xf32> -> vector<128x128xf32>
      %21 = arith.truncf %20 : vector<128x128xf32> to vector<128x128xbf16>
      %c0_18 = arith.constant 0 : index
      %c0_19 = arith.constant 0 : index
      %22 = vector.load %arg6[%c0_18, %c0_19] : memref<128x128xbf16, #tpu.memory_space<vmem>>, vector<128x128xbf16>
      tpu.vector_store %arg6[%c0_18, %c0_19], %21 {strides = array<i32>} : memref<128x128xbf16, #tpu.memory_space<vmem>>, vector<128x128xbf16>,
    } else {
    }
    return
  }
  func.func @transform_0(%arg0: i32, %arg1: i32) -> (i32, i32) {
    %c0_i32 = arith.constant 0 : i32
    return %arg0, %arg1 : i32, i32
  }
  func.func @transform_1(%arg0: i32, %arg1: i32) -> (i32, i32) {
    %c0_i32 = arith.constant 0 : i32
    %c0_i32_0 = arith.constant 0 : i32
    return %arg1, %c0_i32 : i32, i32
  }
  func.func @transform_2(%arg0: i32, %arg1: i32) -> (i32, i32) {
    %c0_i32 = arith.constant 0 : i32
    %c0_i32_0 = arith.constant 0 : i32
    %c0_i32_1 = arith.constant 0 : i32
    return %c0_i32, %c0_i32_0 : i32, i32
  }
  func.func @transform_3(%arg0: i32, %arg1: i32) -> (i32, i32) {
    %c0_i32 = arith.constant 0 : i32
    %c0_i32_0 = arith.constant 0 : i32
    %c0_i32_1 = arith.constant 0 : i32
    return %c0_i32, %c0_i32_0 : i32, i32
  }
  func.func @transform_4(%arg0: i32, %arg1: i32) -> (i32, i32) {
    %c0_i32 = arith.constant 0 : i32
    %c0_i32_0 = arith.constant 0 : i32
    return %arg0, %c0_i32 : i32, i32
  }
}

module attributes {stable_mosaic.version = 11 : i64} {
  func.func @gcn_agg2_kernel(%arg0: i32, %arg1: i32, %arg2: memref<128x128xbf16, #tpu.memory_space<vmem>>, %arg3: memref<128x128xbf16, #tpu.memory_space<vmem>>, %arg4: memref<1x128xf32, #tpu.memory_space<vmem>>, %arg5: memref<128x128xf32, #tpu.memory_space<vmem>>, %arg6: memref<128x128xf32, #tpu.memory_space<vmem>>) attributes {dimension_semantics = [#tpu.dimension_semantics<parallel>, #tpu.dimension_semantics<arbitrary>], iteration_bounds = array<i64: 1, 1>, scalar_prefetch = 0 : i64, scratch_operands = 1 : i64, tpu.core_type = #tpu.core_type<tc>, window_params = [{transform_indices = @transform_0, window_bounds = array<i64: 128, 128>}, {transform_indices = @transform_1, window_bounds = array<i64: 128, 128>}, {pipeline_mode = #tpu.pipeline_mode<synchronous>, transform_indices = @transform_2, window_bounds = array<i64: 1, 128>}, {transform_indices = @transform_3, window_bounds = array<i64: 128, 128>}]} {
    %c0_i32 = arith.constant 0 : i32
    %0 = arith.cmpi eq, %arg1, %c0_i32 : i32
    %1 = arith.extui %0 : i1 to i32
    %c0_i32_0 = arith.constant 0 : i32
    %2 = arith.cmpi ne, %1, %c0_i32_0 : i32
    scf.if %2 {
      %cst_10 = arith.constant 0.000000e+00 : f32
      %12 = vector.broadcast %cst_10 : f32 to vector<128x128xf32>
      %c0_11 = arith.constant 0 : index
      %c0_12 = arith.constant 0 : index
      %13 = vector.load %arg6[%c0_11, %c0_12] : memref<128x128xf32, #tpu.memory_space<vmem>>, vector<128x128xf32>
      tpu.vector_store %arg6[%c0_11, %c0_12], %12 {strides = array<i32>} : memref<128x128xf32, #tpu.memory_space<vmem>>, vector<128x128xf32>,
    } else {
    }
    %c0 = arith.constant 0 : index
    %c0_1 = arith.constant 0 : index
    %3 = vector.load %arg6[%c0, %c0_1] : memref<128x128xf32, #tpu.memory_space<vmem>>, vector<128x128xf32>
    %c0_2 = arith.constant 0 : index
    %c0_3 = arith.constant 0 : index
    %4 = vector.load %arg2[%c0_2, %c0_3] : memref<128x128xbf16, #tpu.memory_space<vmem>>, vector<128x128xbf16>
    %c0_4 = arith.constant 0 : index
    %c0_5 = arith.constant 0 : index
    %5 = vector.load %arg3[%c0_4, %c0_5] : memref<128x128xbf16, #tpu.memory_space<vmem>>, vector<128x128xbf16>
    %cst = arith.constant dense<0.000000e+00> : vector<128x128xf32>
    %6 = tpu.matmul %4, %5, %cst {dimension_numbers = #tpu.dot_dimension_numbers<[1], [0], [0], [1], [0, 0, 1, 1], [], []>} : vector<128x128xbf16>, vector<128x128xbf16>, vector<128x128xf32> -> vector<128x128xf32>
    %7 = arith.addf %3, %6 : vector<128x128xf32>
    %c0_6 = arith.constant 0 : index
    %c0_7 = arith.constant 0 : index
    %8 = vector.load %arg6[%c0_6, %c0_7] : memref<128x128xf32, #tpu.memory_space<vmem>>, vector<128x128xf32>
    tpu.vector_store %arg6[%c0_6, %c0_7], %7 {strides = array<i32>} : memref<128x128xf32, #tpu.memory_space<vmem>>, vector<128x128xf32>,
    %c0_i32_8 = arith.constant 0 : i32
    %9 = arith.cmpi eq, %arg1, %c0_i32_8 : i32
    %10 = arith.extui %9 : i1 to i32
    %c0_i32_9 = arith.constant 0 : i32
    %11 = arith.cmpi ne, %10, %c0_i32_9 : i32
    scf.if %11 {
      %c0_10 = arith.constant 0 : index
      %c0_11 = arith.constant 0 : index
      %12 = vector.load %arg6[%c0_10, %c0_11] : memref<128x128xf32, #tpu.memory_space<vmem>>, vector<128x128xf32>
      %c0_12 = arith.constant 0 : index
      %c0_13 = arith.constant 0 : index
      %13 = vector.load %arg4[%c0_12, %c0_13] : memref<1x128xf32, #tpu.memory_space<vmem>>, vector<1x128xf32>
      %14 = vector.broadcast %13 : vector<1x128xf32> to vector<128x128xf32>
      %15 = arith.addf %12, %14 : vector<128x128xf32>
      %c0_14 = arith.constant 0 : index
      %c0_15 = arith.constant 0 : index
      %16 = vector.load %arg5[%c0_14, %c0_15] : memref<128x128xf32, #tpu.memory_space<vmem>>, vector<128x128xf32>
      tpu.vector_store %arg5[%c0_14, %c0_15], %15 {strides = array<i32>} : memref<128x128xf32, #tpu.memory_space<vmem>>, vector<128x128xf32>,
    } else {
    }
    return
  }
  func.func @transform_0(%arg0: i32, %arg1: i32) -> (i32, i32) {
    %c0_i32 = arith.constant 0 : i32
    return %arg0, %arg1 : i32, i32
  }
  func.func @transform_1(%arg0: i32, %arg1: i32) -> (i32, i32) {
    %c0_i32 = arith.constant 0 : i32
    %c0_i32_0 = arith.constant 0 : i32
    return %arg1, %c0_i32 : i32, i32
  }
  func.func @transform_2(%arg0: i32, %arg1: i32) -> (i32, i32) {
    %c0_i32 = arith.constant 0 : i32
    %c0_i32_0 = arith.constant 0 : i32
    %c0_i32_1 = arith.constant 0 : i32
    return %c0_i32, %c0_i32_0 : i32, i32
  }
  func.func @transform_3(%arg0: i32, %arg1: i32) -> (i32, i32) {
    %c0_i32 = arith.constant 0 : i32
    %c0_i32_0 = arith.constant 0 : i32
    return %arg0, %c0_i32 : i32, i32
  }
}

</mosaic_0001>

<bundles_post_ra>
// kernel: gcn_anchored_forward.3
= control target key start
LH: loop header
LB: loop body
LE: loop exit
PB: predicated region body
PF: predicated region fallthrough
CT: control target
= control target key end

     0   :  { %s586_s1 = inlined_call_operand.vmem [shape: bf16[128,128], index: 1, kind: input, shape index: {}]   ;;  %s587_s0 = inlined_call_operand.vmem [shape: bf16[128,128], index: 0, kind: input, shape index: {}]   ;;  %s588_s2 = inlined_call_operand.vmem [shape: f32[1,128], index: 2, kind: input, shape index: {}]   ;;  %s589_s3 = inlined_call_operand.vmem [shape: f32[128,128], index: 3, kind: output, shape index: {}]  }
   0x1   :  { %v451_v0 = vld [vmem:[%s586_s1] sm:$0xff]   ;;  %v452_v1 = vld [vmem:[%s586_s1 + $0x8] sm:$0xff]   ;;  %v453_v2 = vld [vmem:[%s586_s1 + $0x10] sm:$0xff]  }
   0x2   :  { %403 = vmatprep.subr.bf16.mxu0 %v451_v0  ;;  %435 = vmatprep.subr.bf16.mxu1 %v451_v0  ;;  %v454_v3 = vld [vmem:[%s586_s1 + $0x18] sm:$0xff]   ;;  %v459_v4 = vld [vmem:[%s587_s0] sm:$0xff]   ;;  %v456_v7 = vld [vmem:[%s586_s1 + $0x28] sm:$0xff]  }
   0x3   :  { %404 = vmatpush3.bf16.msra.mxu0 %v451_v0  ;;  %443 = vmatpush3.bf16.msra.mxu1 %v451_v0  ;;  %v460_v5 = vld [vmem:[%s587_s0 + $0x20] sm:$0xff]   ;;  %v457_v8 = vld [vmem:[%s586_s1 + $0x30] sm:$0xff]   ;;  %v458_v9 = vld [vmem:[%s586_s1 + $0x38] sm:$0xff]  }
   0x4   :  { %405 = vmatprep.subr.bf16.mxu0 %v452_v1  ;;  %436 = vmatprep.subr.bf16.mxu1 %v452_v1  ;;  %v455_v6 = vld [vmem:[%s586_s1 + $0x20] sm:$0xff]   ;;  %v461_v10 = vld [vmem:[%s587_s0 + $0x8] sm:$0xff]   ;;  %v463_v12 = vld [vmem:[%s587_s0 + $0x10] sm:$0xff]  }
   0x5   :  { %419 = vmatprep.mubr.bf16.mxu0 %v459_v4  ;;  %427 = vmatprep.mubr.bf16.mxu1 %v460_v5  ;;  %v462_v11 = vld [vmem:[%s587_s0 + $0x28] sm:$0xff]   ;;  %v464_v13 = vld [vmem:[%s587_s0 + $0x30] sm:$0xff]   ;;  %v465_v14 = vld [vmem:[%s587_s0 + $0x18] sm:$0xff]  }
   0x6   :  { %v466_v15 = vld [vmem:[%s587_s0 + $0x38] sm:$0xff]   ;;  %v386_v16 = vld [vmem:[%s588_s2] ss:$0 sm:$0xff] }
   0x7   :  { %406 = vmatpush3.bf16.msra.mxu0 %v452_v1  ;;  %444 = vmatpush3.bf16.msra.mxu1 %v452_v1 }
   0x8   :  { %407 = vmatprep.subr.bf16.mxu0 %v453_v2  ;;  %437 = vmatprep.subr.bf16.mxu1 %v453_v2 }
   0xb   :  { %408 = vmatpush3.bf16.msra.mxu0 %v453_v2  ;;  %445 = vmatpush3.bf16.msra.mxu1 %v453_v2 }
   0xc   :  { %409 = vmatprep.subr.bf16.mxu0 %v454_v3  ;;  %438 = vmatprep.subr.bf16.mxu1 %v454_v3 }
   0xf   :  { %410 = vmatpush3.bf16.msra.mxu0 %v454_v3  ;;  %446 = vmatpush3.bf16.msra.mxu1 %v454_v3 }
  0x10   :  { %411 = vmatprep.subr.bf16.mxu0 %v455_v6  ;;  %439 = vmatprep.subr.bf16.mxu1 %v455_v6 }
  0x13   :  { %412 = vmatpush3.bf16.msra.mxu0 %v455_v6  ;;  %447 = vmatpush3.bf16.msra.mxu1 %v455_v6 }
  0x14   :  { %413 = vmatprep.subr.bf16.mxu0 %v456_v7  ;;  %440 = vmatprep.subr.bf16.mxu1 %v456_v7 }
  0x17   :  { %414 = vmatpush3.bf16.msra.mxu0 %v456_v7  ;;  %448 = vmatpush3.bf16.msra.mxu1 %v456_v7 }
  0x18   :  { %415 = vmatprep.subr.bf16.mxu0 %v457_v8  ;;  %441 = vmatprep.subr.bf16.mxu1 %v457_v8 }
  0x1b   :  { %416 = vmatpush3.bf16.msra.mxu0 %v457_v8  ;;  %449 = vmatpush3.bf16.msra.mxu1 %v457_v8 }
  0x1c   :  { %417 = vmatprep.subr.bf16.mxu0 %v458_v9  ;;  %442 = vmatprep.subr.bf16.mxu1 %v458_v9 }
  0x1f   :  { %418 = vmatpush3.bf16.msra.mxu0 %v458_v9  ;;  %450 = vmatpush3.bf16.msra.mxu1 %v458_v9 }
  0x22   :  { %420 = vmatmul.mubr.bf16.vlgmr.msra.gmra.mrb[0].mxu0 %v461_v10  ;;  %428 = vmatmul.mubr.bf16.vlgmr.msra.gmra.mrb[0].mxu1 %v462_v11 }
  0x23   :  { %423 = vmatprep.mubr.bf16.mxu0 %v463_v12  ;;  %431 = vmatprep.mubr.bf16.mxu1 %v464_v13 }
  0x2a   :  { %424 = vmatmul.mubr.bf16.gmra.mrb[4].mxu0 %v465_v14  ;;  %432 = vmatmul.mubr.bf16.gmra.mrb[4].mxu1 %v466_v15 }
  0xf5   :  { %v421_v17 = vpop.f32.mrb[0].mxu0  ;;  %v429_v18 = vpop.f32.mrb[0].mxu1 }
  0xf6   :  { %v336_v19 = vadd.f32 %v421_v17, %v386_v16  ;;  %v344_v20 = vadd.f32 %v429_v18, %v386_v16  ;;  %v213_v21 = vpop.f32.mrb[1].mxu0  ;;  %v245_v22 = vpop.f32.mrb[1].mxu1 }
  0xf7   :  { %v334_v23 = vadd.f32 %v386_v16, %v213_v21  ;;  %v342_v24 = vadd.f32 %v386_v16, %v245_v22  ;;  %v422_v25 = vpop.f32.mrb[2].mxu0  ;;  %v430_v26 = vpop.f32.mrb[2].mxu1 }
  0xf8   :  { %352 = vst [vmem:[%s589_s3 + $0x10] sm:$0xff] %v336_v19  ;;  %360 = vst [vmem:[%s589_s3 + $0x50] sm:$0xff] %v344_v20  ;;  %v337_v27 = vadd.f32 %v422_v25, %v386_v16  ;;  %v345_v28 = vadd.f32 %v430_v26, %v386_v16  ;;  %v216_v29 = vpop.f32.mrb[3].mxu0  ;;  %v248_v30 = vpop.f32.mrb[3].mxu1 }
  0xf9   :  { %350 = vst [vmem:[%s589_s3] sm:$0xff] %v334_v23  ;;  %358 = vst [vmem:[%s589_s3 + $0x40] sm:$0xff] %v342_v24  ;;  %v335_v31 = vadd.f32 %v386_v16, %v216_v29  ;;  %v343_v32 = vadd.f32 %v386_v16, %v248_v30 }
  0xfa   :  { %353 = vst [vmem:[%s589_s3 + $0x18] sm:$0xff] %v337_v27  ;;  %361 = vst [vmem:[%s589_s3 + $0x58] sm:$0xff] %v345_v28 }
  0xfb   :  { %351 = vst [vmem:[%s589_s3 + $0x8] sm:$0xff] %v335_v31  ;;  %359 = vst [vmem:[%s589_s3 + $0x48] sm:$0xff] %v343_v32 }
  0xfd   :  { %v425_v33 = vpop.f32.mrb[4].mxu0  ;;  %v433_v34 = vpop.f32.mrb[4].mxu1 }
  0xfe   :  { %v340_v35 = vadd.f32 %v425_v33, %v386_v16  ;;  %v348_v36 = vadd.f32 %v433_v34, %v386_v16  ;;  %v229_v37 = vpop.f32.mrb[5].mxu0  ;;  %v261_v38 = vpop.f32.mrb[5].mxu1 }
  0xff   :  { %v338_v39 = vadd.f32 %v386_v16, %v229_v37  ;;  %v346_v40 = vadd.f32 %v386_v16, %v261_v38  ;;  %v426_v41 = vpop.f32.mrb[6].mxu0  ;;  %v434_v42 = vpop.f32.mrb[6].mxu1 }
 0x100   :  { %356 = vst [vmem:[%s589_s3 + $0x30] sm:$0xff] %v340_v35  ;;  %364 = vst [vmem:[%s589_s3 + $0x70] sm:$0xff] %v348_v36  ;;  %v341_v43 = vadd.f32 %v426_v41, %v386_v16  ;;  %v349_v44 = vadd.f32 %v434_v42, %v386_v16  ;;  %v232_v45 = vpop.f32.mrb[7].mxu0  ;;  %v264_v46 = vpop.f32.mrb[7].mxu1 }
 0x101   :  { %354 = vst [vmem:[%s589_s3 + $0x20] sm:$0xff] %v338_v39  ;;  %362 = vst [vmem:[%s589_s3 + $0x60] sm:$0xff] %v346_v40  ;;  %v339_v47 = vadd.f32 %v386_v16, %v232_v45  ;;  %v347_v48 = vadd.f32 %v386_v16, %v264_v46 }
 0x102   :  { %357 = vst [vmem:[%s589_s3 + $0x38] sm:$0xff] %v341_v43  ;;  %365 = vst [vmem:[%s589_s3 + $0x78] sm:$0xff] %v349_v44 }
 0x103   :  { %355 = vst [vmem:[%s589_s3 + $0x28] sm:$0xff] %v339_v47  ;;  %363 = vst [vmem:[%s589_s3 + $0x68] sm:$0xff] %v347_v48 }

// kernel: gcn_anchored_forward.2
= control target key start
LH: loop header
LB: loop body
LE: loop exit
PB: predicated region body
PF: predicated region fallthrough
CT: control target
= control target key end

     0   :  { %s970_s1 = inlined_call_operand.vmem [shape: bf16[128,128], index: 1, kind: input, shape index: {}]   ;;  %s971_s0 = inlined_call_operand.vmem [shape: bf16[128,128], index: 0, kind: input, shape index: {}]   ;;  %s972_s3 = inlined_call_operand.vmem [shape: bf16[128,128], index: 3, kind: input, shape index: {}]   ;;  %s973_s2 = inlined_call_operand.vmem [shape: f32[1,128], index: 2, kind: input, shape index: {}]   ;;  %s974_s4 = inlined_call_operand.vmem [shape: bf16[128,128], index: 4, kind: output, shape index: {}]  }
   0x1   :  { %v822_v0 = vld [vmem:[%s970_s1] sm:$0xff]   ;;  %v823_v1 = vld [vmem:[%s970_s1 + $0x8] sm:$0xff]   ;;  %v824_v2 = vld [vmem:[%s970_s1 + $0x10] sm:$0xff]  }
   0x2   :  { %758 = vmatprep.subr.bf16.mxu0 %v822_v0  ;;  %v825_v3 = vld [vmem:[%s970_s1 + $0x18] sm:$0xff]   ;;  %v830_v4 = vld [vmem:[%s971_s0] sm:$0xff]   ;;  %v827_v6 = vld [vmem:[%s970_s1 + $0x28] sm:$0xff]  }
   0x3   :  { %759 = vmatpush3.bf16.msra.mxu0 %v822_v0  ;;  %774 = vmatprep.mubr.bf16.mxu0 %v830_v4  ;;  %v826_v5 = vld [vmem:[%s970_s1 + $0x20] sm:$0xff]   ;;  %v839_v8 = vld [vmem:[%s972_s3 + $0x8] sm:$0xff]   ;;  %v828_v9 = vld [vmem:[%s970_s1 + $0x30] sm:$0xff]  }
   0x4   :  { %760 = vmatprep.subr.bf16.mxu0 %v823_v1  ;;  %v838_v7 = vld [vmem:[%s972_s3] sm:$0xff]   ;;  %v840_v10 = vld [vmem:[%s972_s3 + $0x10] sm:$0xff]   ;;  %v829_v11 = vld [vmem:[%s970_s1 + $0x38] sm:$0xff]  }
   0x5   :  { %790 = vmatprep.subr.bf16.mxu1 %v838_v7  ;;  %v841_v12 = vld [vmem:[%s972_s3 + $0x18] sm:$0xff]   ;;  %v842_v13 = vld [vmem:[%s972_s3 + $0x20] sm:$0xff]   ;;  %v831_v14 = vld [vmem:[%s971_s0 + $0x8] sm:$0xff]  }
   0x6   :  { %791 = vmatpush3.bf16.msra.mxu1 %v838_v7  ;;  %v832_v15 = vld [vmem:[%s971_s0 + $0x10] sm:$0xff]   ;;  %v843_v16 = vld [vmem:[%s972_s3 + $0x28] sm:$0xff]   ;;  %v833_v17 = vld [vmem:[%s971_s0 + $0x18] sm:$0xff]  }
   0x7   :  { %761 = vmatpush3.bf16.msra.mxu0 %v823_v1  ;;  %792 = vmatprep.subr.bf16.mxu1 %v839_v8  ;;  %v834_v18 = vld [vmem:[%s971_s0 + $0x20] sm:$0xff]   ;;  %v835_v19 = vld [vmem:[%s971_s0 + $0x28] sm:$0xff]   ;;  %v836_v20 = vld [vmem:[%s971_s0 + $0x30] sm:$0xff]  }
   0x8   :  { %762 = vmatprep.subr.bf16.mxu0 %v824_v2  ;;  %v837_v21 = vld [vmem:[%s971_s0 + $0x38] sm:$0xff]   ;;  %v844_v22 = vld [vmem:[%s972_s3 + $0x30] sm:$0xff]   ;;  %v638_v24 = vld [vmem:[%s973_s2] ss:$0 sm:$0xff] }
   0x9   :  { %v845_v23 = vld [vmem:[%s972_s3 + $0x38] sm:$0xff]  }
   0xa   :  { %793 = vmatpush3.bf16.msra.mxu1 %v839_v8 }
   0xb   :  { %763 = vmatpush3.bf16.msra.mxu0 %v824_v2  ;;  %794 = vmatprep.subr.bf16.mxu1 %v840_v10 }
   0xc   :  { %764 = vmatprep.subr.bf16.mxu0 %v825_v3 }
   0xe   :  { %795 = vmatpush3.bf16.msra.mxu1 %v840_v10 }
   0xf   :  { %765 = vmatpush3.bf16.msra.mxu0 %v825_v3  ;;  %796 = vmatprep.subr.bf16.mxu1 %v841_v12 }
  0x10   :  { %766 = vmatprep.subr.bf16.mxu0 %v826_v5 }
  0x12   :  { %797 = vmatpush3.bf16.msra.mxu1 %v841_v12 }
  0x13   :  { %767 = vmatpush3.bf16.msra.mxu0 %v826_v5  ;;  %798 = vmatprep.subr.bf16.mxu1 %v842_v13 }
  0x14   :  { %768 = vmatprep.subr.bf16.mxu0 %v827_v6 }
  0x16   :  { %799 = vmatpush3.bf16.msra.mxu1 %v842_v13 }
  0x17   :  { %769 = vmatpush3.bf16.msra.mxu0 %v827_v6  ;;  %800 = vmatprep.subr.bf16.mxu1 %v843_v16 }
  0x18   :  { %770 = vmatprep.subr.bf16.mxu0 %v828_v9 }
  0x1a   :  { %801 = vmatpush3.bf16.msra.mxu1 %v843_v16 }
  0x1b   :  { %771 = vmatpush3.bf16.msra.mxu0 %v828_v9  ;;  %802 = vmatprep.subr.bf16.mxu1 %v844_v22 }
  0x1c   :  { %772 = vmatprep.subr.bf16.mxu0 %v829_v11 }
  0x1e   :  { %803 = vmatpush3.bf16.msra.mxu1 %v844_v22 }
  0x1f   :  { %773 = vmatpush3.bf16.msra.mxu0 %v829_v11  ;;  %804 = vmatprep.subr.bf16.mxu1 %v845_v23 }
  0x22   :  { %775 = vmatmul.mubr.bf16.vlgmr.msra.gmra.mrb[0].mxu0 %v831_v14  ;;  %805 = vmatpush3.bf16.msra.mxu1 %v845_v23 }
  0x23   :  { %778 = vmatprep.mubr.bf16.mxu0 %v832_v15 }
  0x2a   :  { %779 = vmatmul.mubr.bf16.gmra.mrb[4].mxu0 %v833_v17 }
  0x2b   :  { %782 = vmatprep.mubr.bf16.mxu0 %v834_v18 }
  0x32   :  { %783 = vmatmul.mubr.bf16.gmra.mrb[8].mxu0 %v835_v19 }
  0x33   :  { %786 = vmatprep.mubr.bf16.mxu0 %v836_v20 }
  0x3a   :  { %787 = vmatmul.mubr.bf16.gmra.mrb[12].mxu0 %v837_v21 }
  0xf5   :  { %v776_v25 = vpop.f32.mrb[0].mxu0 }
  0xf6   :  { %v339_v26 = vadd.f32 %v776_v25, %v638_v24  ;;  %v216_v27 = vpop.f32.mrb[1].mxu0 }
  0xf7   :  { %v337_v28 = vadd.f32 %v638_v24, %v216_v27  ;;  %v777_v29 = vpop.f32.mrb[2].mxu0 }
  0xf8   :  { %v340_v30 = vadd.f32 %v777_v29, %v638_v24  ;;  %v219_v31 = vpop.f32.mrb[3].mxu0  ;;  %v355_v33 = vmax.f32 %v339_v26, 0.0 }
  0xf9   :  { %v338_v32 = vadd.f32 %v638_v24, %v219_v31  ;;  %v353_v35 = vmax.f32 %v337_v28, 0.0 }
  0xfa   :  { %v356_v34 = vmax.f32 %v340_v30, 0.0 }
  0xfb   :  { %v354_v36 = vmax.f32 %v338_v32, 0.0 }
  0xfc   :  { %v370_v37 = vpack.c.bf16 %v356_v34, %v355_v33 }
  0xfd   :  { %v780_v38 = vpop.f32.mrb[4].mxu0  ;;  %v369_v39 = vpack.c.bf16 %v354_v36, %v353_v35 }
  0xfe   :  { %v343_v40 = vadd.f32 %v780_v38, %v638_v24  ;;  %v232_v41 = vpop.f32.mrb[5].mxu0 }
  0xff   :  { %v341_v42 = vadd.f32 %v638_v24, %v232_v41  ;;  %v781_v43 = vpop.f32.mrb[6].mxu0  ;;  %806 = vmatprep.mubr.bf16.mxu1 %v369_v39 }
 0x100   :  { %v344_v44 = vadd.f32 %v781_v43, %v638_v24  ;;  %v235_v45 = vpop.f32.mrb[7].mxu0  ;;  %807 = vmatmul.mubr.bf16.vlgmr.msra.gmra.mrb[0].mxu1 %v370_v37  ;;  %v359_v47 = vmax.f32 %v343_v40, 0.0 }
 0x101   :  { %v342_v46 = vadd.f32 %v638_v24, %v235_v45  ;;  %v357_v49 = vmax.f32 %v341_v42, 0.0 }
 0x102   :  { %v360_v48 = vmax.f32 %v344_v44, 0.0 }
 0x103   :  { %v358_v50 = vmax.f32 %v342_v46, 0.0 }
 0x104   :  { %v372_v51 = vpack.c.bf16 %v360_v48, %v359_v47 }
 0x105   :  { %v371_v52 = vpack.c.bf16 %v358_v50, %v357_v49  ;;  %v784_v53 = vpop.f32.mrb[8].mxu0 }
 0x106   :  { %v347_v54 = vadd.f32 %v784_v53, %v638_v24  ;;  %v248_v55 = vpop.f32.mrb[9].mxu0 }
 0x107   :  { %v345_v56 = vadd.f32 %v638_v24, %v248_v55  ;;  %v785_v57 = vpop.f32.mrb[10].mxu0  ;;  %810 = vmatprep.mubr.bf16.mxu1 %v371_v52 }
 0x108   :  { %v348_v58 = vadd.f32 %v785_v57, %v638_v24  ;;  %v251_v59 = vpop.f32.mrb[11].mxu0  ;;  %811 = vmatmul.mubr.bf16.gmra.mrb[4].mxu1 %v372_v51  ;;  %v363_v61 = vmax.f32 %v347_v54, 0.0 }
 0x109   :  { %v346_v60 = vadd.f32 %v638_v24, %v251_v59  ;;  %v361_v63 = vmax.f32 %v345_v56, 0.0 }
 0x10a   :  { %v364_v62 = vmax.f32 %v348_v58, 0.0 }
 0x10b   :  { %v362_v0 = vmax.f32 %v346_v60, 0.0 }
 0x10c   :  { %v374_v1 = vpack.c.bf16 %v364_v62, %v363_v61 }
 0x10d   :  { %v373_v2 = vpack.c.bf16 %v362_v0, %v361_v63  ;;  %v788_v3 = vpop.f32.mrb[12].mxu0 }
 0x10e   :  { %v351_v4 = vadd.f32 %v788_v3, %v638_v24  ;;  %v264_v5 = vpop.f32.mrb[13].mxu0 }
 0x10f   :  { %v349_v6 = vadd.f32 %v638_v24, %v264_v5  ;;  %v789_v7 = vpop.f32.mrb[14].mxu0  ;;  %814 = vmatprep.mubr.bf16.mxu1 %v373_v2 }
 0x110   :  { %v352_v8 = vadd.f32 %v789_v7, %v638_v24  ;;  %v267_v9 = vpop.f32.mrb[15].mxu0  ;;  %815 = vmatmul.mubr.bf16.gmra.mrb[8].mxu1 %v374_v1  ;;  %v367_v11 = vmax.f32 %v351_v4, 0.0 }
 0x111   :  { %v350_v10 = vadd.f32 %v638_v24, %v267_v9  ;;  %v365_v13 = vmax.f32 %v349_v6, 0.0 }
 0x112   :  { %v368_v12 = vmax.f32 %v352_v8, 0.0 }
 0x113   :  { %v366_v14 = vmax.f32 %v350_v10, 0.0 }
 0x114   :  { %v376_v15 = vpack.c.bf16 %v368_v12, %v367_v11 }
 0x115   :  { %v375_v16 = vpack.c.bf16 %v366_v14, %v365_v13 }
 0x117   :  { %818 = vmatprep.mubr.bf16.mxu1 %v375_v16 }
 0x118   :  { %819 = vmatmul.mubr.bf16.gmra.mrb[12].mxu1 %v376_v15 }
 0x1d3   :  { %v808_v17 = vpop.f32.mrb[0].mxu1 }
 0x1d4   :  { %v475_v18 = vpop.f32.mrb[1].mxu1 }
 0x1d5   :  { %v809_v19 = vpop.f32.mrb[2].mxu1 }
 0x1d6   :  { %v687_v20 = vpack.c.bf16 %v809_v19, %v808_v17  ;;  %v478_v21 = vpop.f32.mrb[3].mxu1 }
 0x1d7   :  { %v682_v22 = vpack.c.bf16 %v478_v21, %v475_v18 }
 0x1d8   :  { %719 = vst [vmem:[%s974_s4 + $0x8] sm:$0xff] %v687_v20  }
 0x1d9   :  { %683 = vst [vmem:[%s974_s4] sm:$0xff] %v682_v22  }
 0x1db   :  { %v812_v23 = vpop.f32.mrb[4].mxu1 }
 0x1dc   :  { %v491_v24 = vpop.f32.mrb[5].mxu1 }
 0x1dd   :  { %v813_v25 = vpop.f32.mrb[6].mxu1 }
 0x1de   :  { %v697_v26 = vpack.c.bf16 %v813_v25, %v812_v23  ;;  %v494_v27 = vpop.f32.mrb[7].mxu1 }
 0x1df   :  { %v692_v28 = vpack.c.bf16 %v494_v27, %v491_v24 }
 0x1e0   :  { %721 = vst [vmem:[%s974_s4 + $0x18] sm:$0xff] %v697_v26  }
 0x1e1   :  { %720 = vst [vmem:[%s974_s4 + $0x10] sm:$0xff] %v692_v28  }
 0x1e3   :  { %v816_v29 = vpop.f32.mrb[8].mxu1 }
 0x1e4   :  { %v507_v30 = vpop.f32.mrb[9].mxu1 }
 0x1e5   :  { %v817_v31 = vpop.f32.mrb[10].mxu1 }
 0x1e6   :  { %v707_v32 = vpack.c.bf16 %v817_v31, %v816_v29  ;;  %v510_v33 = vpop.f32.mrb[11].mxu1 }
 0x1e7   :  { %v702_v34 = vpack.c.bf16 %v510_v33, %v507_v30 }
 0x1e8   :  { %723 = vst [vmem:[%s974_s4 + $0x28] sm:$0xff] %v707_v32  }
 0x1e9   :  { %722 = vst [vmem:[%s974_s4 + $0x20] sm:$0xff] %v702_v34  }
 0x1eb   :  { %v820_v35 = vpop.f32.mrb[12].mxu1 }
 0x1ec   :  { %v523_v36 = vpop.f32.mrb[13].mxu1 }
 0x1ed   :  { %v821_v37 = vpop.f32.mrb[14].mxu1 }
 0x1ee   :  { %v717_v38 = vpack.c.bf16 %v821_v37, %v820_v35  ;;  %v526_v39 = vpop.f32.mrb[15].mxu1 }
 0x1ef   :  { %v712_v40 = vpack.c.bf16 %v526_v39, %v523_v36 }
 0x1f0   :  { %725 = vst [vmem:[%s974_s4 + $0x38] sm:$0xff] %v717_v38  }
 0x1f1   :  { %724 = vst [vmem:[%s974_s4 + $0x30] sm:$0xff] %v712_v40  }

</bundles_post_ra>
